<compile_context>
chip_gen: v7x
topology: tpu7x:2x2x1
jax: 0.10.0
libtpu: 0.0.40
codegen_flags: <defaults>
</compile_context>

<pallas_src>
import functools

import jax
import jax.numpy as jnp
import numpy as np
from jax import lax
from jax.experimental import pallas as pl
from jax.experimental.pallas import tpu as pltpu

BN_EPS = 1e-5

# Raise the scoped-VMEM ceiling above the 16/32 MiB defaults while staying under
# every generation's physical budget (64 MiB per TensorCore on v7x).
_VMEM_LIMIT = 48 * 1024 * 1024

# Matmul-operand dtype.  jnp.bfloat16 ~doubles MXU throughput on v6e/v7x and
# halves patch/weight VMEM (accumulation stays f32 via preferred_element_type);
# kept f32 here so the self-check tolerance vs. the f32 reference holds.
_COMPUTE_DTYPE = jnp.float32


# ----------------------------------------------------------------------------
# Pass 1: per-channel batch statistics (train-mode BatchNorm), centered.
# ----------------------------------------------------------------------------
def _stats_kernel(x_ref, mean_ref, m2_ref, *, ts):
    """Running per-channel mean / centered SSQ over spatial tiles (Chan combine)."""
    s = pl.program_id(1)
    xb = x_ref[0]                                       # (C, TS) f32, lane-dense
    bm = jnp.mean(xb, axis=1, keepdims=True)            # block mean       (C, 1)
    d = xb - bm
    bm2 = jnp.sum(d * d, axis=1, keepdims=True)         # block ctr. SSQ   (C, 1)

    @pl.when(s == 0)
    def _():
        mean_ref[0] = bm
        m2_ref[0] = bm2

    @pl.when(s > 0)
    def _():
        na = (s * ts).astype(jnp.float32)                # samples seen so far
        nb = float(ts)
        tot = na + nb
        ma = mean_ref[0]
        delta = bm - ma
        mean_ref[0] = ma + delta * (nb / tot)
        m2_ref[0] = m2_ref[0] + bm2 + delta * delta * (na * nb / tot)


def _choose_spatial_tile(hw, c):
    """Largest multiple-of-128 divisor of H*W whose (C, TS) f32 block is <= ~8 MiB."""
    max_ts = max(128, (8 * 1024 * 1024) // (4 * max(c, 1)))
    best = None
    for ts in range(128, min(hw, max_ts) + 1, 128):
        if hw % ts == 0:
            best = ts
    return best if best is not None else hw              # full extent always legal


def _per_channel_stats(x):
    """x: (N, C, H, W) f32 -> per-channel (mean, biased var), each (C,)."""
    N, C, H, W = x.shape
    hw = H * W
    x2 = x.reshape(N, C, hw)                             # contiguous view, free
    ts = _choose_spatial_tile(hw, C)
    S = hw // ts

    kernel = functools.partial(_stats_kernel, ts=ts)
    img_mean, img_m2 = pl.pallas_call(
        kernel,
        out_shape=(jax.ShapeDtypeStruct((N, C, 1), jnp.float32),
                   jax.ShapeDtypeStruct((N, C, 1), jnp.float32)),
        grid=(N, S),
        in_specs=[pl.BlockSpec((1, C, ts), lambda n, s: (n, 0, s))],
        out_specs=(pl.BlockSpec((1, C, 1), lambda n, s: (n, 0, 0)),
                   pl.BlockSpec((1, C, 1), lambda n, s: (n, 0, 0))),
        compiler_params=pltpu.CompilerParams(
            dimension_semantics=("parallel", "arbitrary"),
            vmem_limit_bytes=_VMEM_LIMIT),
    )(x2)

    # Exact combine of the N per-image (mean, M2) pairs (equal counts), O(N*C).
    img_mean = img_mean[..., 0]                          # (N, C)
    img_m2 = img_m2[..., 0]                              # (N, C)
    mean = jnp.mean(img_mean, axis=0)                    # (C,)
    var = (jnp.sum(img_m2, axis=0)
           + hw * jnp.sum(jnp.square(img_mean - mean[None, :]), axis=0)) / (N * hw)
    return mean, var


# ----------------------------------------------------------------------------
# Pass 2: fused BN-affine + ReLU + zero-pad + 3x3 conv (+ bias), NCHW output.
# ----------------------------------------------------------------------------
def _bn_relu_conv_kernel(scale_ref, shift_ref, x_ref, w_ref, b_ref, o_ref,
                         awin_ref, patch_ref, *, TH, H, W, C, Cout):
    # scale/shift : (1, C)          folded BN affine
    # x_ref       : (1, H, W, C)    full NHWC image (resident across row tiles)
    # w_ref       : (Cout, 9*C)     K-concat conv weights (tap-major, chan-minor)
    # b_ref       : (Cout, 1)
    # o_ref       : (1, Cout, TH*W) NCHW output rows (lane-dense along TH*W)
    # awin_ref    : VMEM (TH+2, W+2, C)  zero-padded activation window (per tile)
    # patch_ref   : VMEM (TH*W, 9*C)     im2col patch -> single K=9C matmul
    j = pl.program_id(1)
    nj = pl.num_programs(1)
    r0 = pl.multiple_of(j * TH, TH)

    def act(v):  # BN affine + ReLU, broadcasts over the trailing channel dim
        return jnp.maximum(v * scale_ref[...] + shift_ref[...], 0.0)

    # --- padded activation window: zero only the border, recompute 1-row halos
    zcol = jnp.zeros((TH + 2, 1, C), jnp.float32)
    awin_ref[:, 0:1, :] = zcol                                      # left pad col
    awin_ref[:, W + 1:W + 2, :] = zcol                              # right pad col
    awin_ref[1:TH + 1, 1:W + 1, :] = act(x_ref[0, pl.ds(r0, TH), :, :])

    @pl.when(j == 0)
    def _():
        awin_ref[0:1, 1:W + 1, :] = jnp.zeros((1, W, C), jnp.float32)

    @pl.when(j > 0)
    def _():
        awin_ref[0:1, 1:W + 1, :] = act(x_ref[0, pl.ds(r0 - 1, 1), :, :])

    @pl.when(j == nj - 1)
    def _():
        awin_ref[TH + 1:TH + 2, 1:W + 1, :] = jnp.zeros((1, W, C), jnp.float32)

    @pl.when(j < nj - 1)
    def _():
        awin_ref[TH + 1:TH + 2, 1:W + 1, :] = act(x_ref[0, pl.ds(r0 + TH, 1), :, :])

    # --- implicit im2col: concatenate the 9 taps along K -> ONE MXU matmul ----
    # TODO(synk): tap shifting could move onto the XLU with pltpu.roll instead of
    # slice+reshape copies; kept as static slices for robust lowering.
    for t in range(9):
        ky, kx = divmod(t, 3)
        tap = awin_ref[ky:ky + TH, kx:kx + W, :]                    # (TH, W, C)
        patch_ref[:, t * C:(t + 1) * C] = (
            tap.reshape(TH * W, C).astype(patch_ref.dtype))

    # out[co, p] = sum_k w[co, k] * patch[p, k]   (K = 9*C, result already NCHW)
    res = lax.dot_general(
        w_ref[...], patch_ref[...],
        dimension_numbers=(((1,), (1,)), ((), ())),
        preferred_element_type=jnp.float32)                         # (Cout, TH*W)
    o_ref[0] = (res + b_ref[...]).astype(o_ref.dtype)


def _choose_row_tile(H, W, C):
    """TH | H, TH*W a multiple of 128 (unless TH == H), ~2K px/tile, VMEM-capped."""
    cap_px = max(128, (8 * 1024 * 1024) // (4 * 10 * max(C, 1)))   # patch+window f32
    target_th = max(1, min(2048, cap_px) // max(W, 1))
    cands = [th for th in range(1, H + 1)
             if H % th == 0 and (th == H or (th * W) % 128 == 0)]
    le = [th for th in cands if th <= target_th]
    return max(le) if le else min(cands)


def conv_block_forward(params, x):
    """ConvBlock.forward: BatchNorm2d (batch stats) -> ReLU -> Conv2d(3x3, pad=1)."""
    N, C, H, W = x.shape
    w, bias = params["conv_w"], params["conv_b"]
    gamma, beta = params["bn_g"], params["bn_b"]
    Cout = w.shape[0]
    assert w.shape == (Cout, C, 3, 3)

    # ---- BN batch statistics (Pallas pass 1), folded into a per-channel affine
    mean, var = _per_channel_stats(x)
    scale = gamma * lax.rsqrt(var + BN_EPS)                         # (C,)
    shift = beta - mean * scale                                     # (C,)

    # ---- parameter prep (O(Cout*C) glue) ----
    # w_mat[co, (ky*3+kx)*C + c] = w[co, c, ky, kx]  (matches patch column order)
    w_mat = jnp.transpose(w, (0, 2, 3, 1)).reshape(Cout, 9 * C).astype(_COMPUTE_DTYPE)
    b_col = bias.reshape(Cout, 1).astype(jnp.float32)

    # Channels-last input so the im2col patch is channel-minor inside the kernel.
    # TODO(synk): fuse this remaining transpose into the kernel (in-kernel
    # (C,hw)->(hw,C) relayout / pltpu.einshape) to drop this extra HBM pass.
    x_nhwc = jnp.transpose(x, (0, 2, 3, 1))

    TH = _choose_row_tile(H, W, C)
    TW = TH * W
    # TODO(synk): for very large images (v7x 64 MiB VMEM) replace the resident
    # full-image block with halo'd row-window DMA so VMEM scales with TH, not H.

    kernel = functools.partial(_bn_relu_conv_kernel,
                               TH=TH, H=H, W=W, C=C, Cout=Cout)
    # Output written directly in (N, Cout, H*W): lane-dense TW-wide stores at the
    # true Cout width (no padded channels, no output transpose / slice pass).
    y2 = pl.pallas_call(
        kernel,
        out_shape=jax.ShapeDtypeStruct((N, Cout, H * W), jnp.float32),
        grid=(N, H // TH),
        in_specs=[
            pl.BlockSpec((1, C), lambda n, j: (0, 0)),                # scale
            pl.BlockSpec((1, C), lambda n, j: (0, 0)),                # shift
            pl.BlockSpec((1, H, W, C), lambda n, j: (n, 0, 0, 0)),    # image
            pl.BlockSpec((Cout, 9 * C), lambda n, j: (0, 0)),         # conv weights
            pl.BlockSpec((Cout, 1), lambda n, j: (0, 0)),             # bias
        ],
        out_specs=pl.BlockSpec((1, Cout, TW), lambda n, j: (n, 0, j)),
        scratch_shapes=[
            pltpu.VMEM((TH + 2, W + 2, C), jnp.float32),              # act window
            pltpu.VMEM((TW, 9 * C), _COMPUTE_DTYPE),                  # im2col patch
        ],
        compiler_params=pltpu.CompilerParams(
            dimension_semantics=("parallel", "parallel"),
            vmem_limit_bytes=_VMEM_LIMIT),
    )(scale.reshape(1, C).astype(jnp.float32),
      shift.reshape(1, C).astype(jnp.float32),
      x_nhwc, w_mat, b_col)

    return y2.reshape(N, Cout, H, W)       # contiguous reshape -- no transpose pass


# ----------------------------------------------------------------------------
# Pure-JAX reference (self-check only).
# ----------------------------------------------------------------------------
def conv_block_ref(params, x):
    m = jnp.mean(x, axis=(0, 2, 3), keepdims=True)
    v = jnp.mean(jnp.square(x - m), axis=(0, 2, 3), keepdims=True)
    g = params["bn_g"].reshape(1, -1, 1, 1)
    b = params["bn_b"].reshape(1, -1, 1, 1)
    a = jnp.maximum((x - m) * lax.rsqrt(v + BN_EPS) * g + b, 0.0)
    y = lax.conv_general_dilated(
        a, params["conv_w"], (1, 1), "SAME",
        dimension_numbers=("NCHW", "OIHW", "NCHW"))
    return y + params["conv_b"].reshape(1, -1, 1, 1)


if __name__ == "__main__":
    # ConvBlock(in_channels=4, out_channels=8): x (2, 4, 16, 16)
    N, Cin, Cout, H, W = 2, 4, 8, 16, 16
    key = jax.random.PRNGKey(0)
    ks = jax.random.split(key, 5)
    x = jax.random.normal(ks[0], (N, Cin, H, W), jnp.float32)
    params = dict(
        bn_g=1.0 + 0.1 * jax.random.normal(ks[1], (Cin,), jnp.float32),
        bn_b=0.1 * jax.random.normal(ks[2], (Cin,), jnp.float32),
        conv_w=0.1 * jax.random.normal(ks[3], (Cout, Cin, 3, 3), jnp.float32),
        conv_b=0.1 * jax.random.normal(ks[4], (Cout,), jnp.float32),
    )

    out = jax.block_until_ready(conv_block_forward(params, x))
    ref = jax.block_until_ready(conv_block_ref(params, x))

    assert out.shape == (N, Cout, H, W), out.shape
    np.testing.assert_allclose(np.asarray(out), np.asarray(ref), rtol=2e-3, atol=2e-3)
    print("KERNEL_OK")
</pallas_src>

<mosaic_0001>
module attributes {stable_mosaic.version = 11 : i64} {
  func.func @_stats_kernel(%arg0: i32, %arg1: i32, %arg2: memref<1x4x256xf32, #tpu.memory_space<vmem>>, %arg3: memref<1x4x1xf32, #tpu.memory_space<vmem>>, %arg4: memref<1x4x1xf32, #tpu.memory_space<vmem>>) attributes {dimension_semantics = [#tpu.dimension_semantics<parallel>, #tpu.dimension_semantics<arbitrary>], iteration_bounds = array<i64: 2, 1>, scalar_prefetch = 0 : i64, scratch_operands = 0 : i64, tpu.core_type = #tpu.core_type<tc>, window_params = [{transform_indices = @transform_0, window_bounds = array<i64: 1, 4, 256>}, {transform_indices = @transform_1, window_bounds = array<i64: 1, 4, 1>}, {transform_indices = @transform_2, window_bounds = array<i64: 1, 4, 1>}]} {
    %c0 = arith.constant 0 : index
    %c0_0 = arith.constant 0 : index
    %c0_1 = arith.constant 0 : index
    %0 = vector.load %arg2[%c0, %c0_0, %c0_1] : memref<1x4x256xf32, #tpu.memory_space<vmem>>, vector<1x4x256xf32>
    %1 = vector.shape_cast %0 : vector<1x4x256xf32> to vector<4x256xf32>
    %cst = arith.constant dense<0.000000e+00> : vector<4xf32>
    %2 = vector.multi_reduction <add>, %1, %cst [1] : vector<4x256xf32> to vector<4xf32>
    %3 = vector.shape_cast %2 : vector<4xf32> to vector<4x1xf32>
    %cst_2 = arith.constant 2.560000e+02 : f32
    %4 = vector.broadcast %cst_2 : f32 to vector<4x1xf32>
    %5 = arith.divf %3, %4 : vector<4x1xf32>
    %6 = vector.broadcast %5 : vector<4x1xf32> to vector<4x256xf32>
    %7 = arith.subf %1, %6 : vector<4x256xf32>
    %8 = arith.mulf %7, %7 : vector<4x256xf32>
    %cst_3 = arith.constant dense<0.000000e+00> : vector<4xf32>
    %9 = vector.multi_reduction <add>, %8, %cst_3 [1] : vector<4x256xf32> to vector<4xf32>
    %10 = vector.shape_cast %9 : vector<4xf32> to vector<4x1xf32>
    %c0_i32 = arith.constant 0 : i32
    %11 = arith.cmpi eq, %arg1, %c0_i32 : i32
    %12 = arith.extui %11 : i1 to i32
    %c0_i32_4 = arith.constant 0 : i32
    %13 = arith.cmpi ne, %12, %c0_i32_4 : i32
    scf.if %13 {
      %c0_7 = arith.constant 0 : index
      %c0_8 = arith.constant 0 : index
      %c0_9 = arith.constant 0 : index
      %17 = vector.load %arg3[%c0_7, %c0_8, %c0_9] : memref<1x4x1xf32, #tpu.memory_space<vmem>>, vector<1x4x1xf32>
      %18 = vector.shape_cast %17 : vector<1x4x1xf32> to vector<4x1xf32>
      %19 = vector.shape_cast %5 : vector<4x1xf32> to vector<1x4x1xf32>
      tpu.vector_store %arg3[%c0_7, %c0_8, %c0_9], %19 {strides = array<i32>} : memref<1x4x1xf32, #tpu.memory_space<vmem>>, vector<1x4x1xf32>,
      %c0_10 = arith.constant 0 : index
      %c0_11 = arith.constant 0 : index
      %c0_12 = arith.constant 0 : index
      %20 = vector.load %arg4[%c0_10, %c0_11, %c0_12] : memref<1x4x1xf32, #tpu.memory_space<vmem>>, vector<1x4x1xf32>
      %21 = vector.shape_cast %20 : vector<1x4x1xf32> to vector<4x1xf32>
      %22 = vector.shape_cast %10 : vector<4x1xf32> to vector<1x4x1xf32>
      tpu.vector_store %arg4[%c0_10, %c0_11, %c0_12], %22 {strides = array<i32>} : memref<1x4x1xf32, #tpu.memory_space<vmem>>, vector<1x4x1xf32>,
    } else {
    }
    %c0_i32_5 = arith.constant 0 : i32
    %14 = arith.cmpi sgt, %arg1, %c0_i32_5 : i32
    %15 = arith.extui %14 : i1 to i32
    %c0_i32_6 = arith.constant 0 : i32
    %16 = arith.cmpi ne, %15, %c0_i32_6 : i32
    scf.if %16 {
      %c256_i32 = arith.constant 256 : i32
      %17 = arith.muli %arg1, %c256_i32 : i32
      %18 = arith.sitofp %17 : i32 to f32
      %cst_7 = arith.constant 2.560000e+02 : f32
      %19 = arith.addf %18, %cst_7 : f32
      %c0_8 = arith.constant 0 : index
      %c0_9 = arith.constant 0 : index
      %c0_10 = arith.constant 0 : index
      %20 = vector.load %arg3[%c0_8, %c0_9, %c0_10] : memref<1x4x1xf32, #tpu.memory_space<vmem>>, vector<1x4x1xf32>
      %21 = vector.shape_cast %20 : vector<1x4x1xf32> to vector<4x1xf32>
      %22 = arith.subf %5, %21 : vector<4x1xf32>
      %cst_11 = arith.constant 2.560000e+02 : f32
      %23 = arith.divf %cst_11, %19 : f32
      %24 = vector.broadcast %23 : f32 to vector<4x1xf32>
      %25 = arith.mulf %22, %24 : vector<4x1xf32>
      %26 = arith.addf %21, %25 : vector<4x1xf32>
      %c0_12 = arith.constant 0 : index
      %c0_13 = arith.constant 0 : index
      %c0_14 = arith.constant 0 : index
      %27 = vector.load %arg3[%c0_12, %c0_13, %c0_14] : memref<1x4x1xf32, #tpu.memory_space<vmem>>, vector<1x4x1xf32>
      %28 = vector.shape_cast %27 : vector<1x4x1xf32> to vector<4x1xf32>
      %29 = vector.shape_cast %26 : vector<4x1xf32> to vector<1x4x1xf32>
      tpu.vector_store %arg3[%c0_12, %c0_13, %c0_14], %29 {strides = array<i32>} : memref<1x4x1xf32, #tpu.memory_space<vmem>>, vector<1x4x1xf32>,
      %c0_15 = arith.constant 0 : index
      %c0_16 = arith.constant 0 : index
      %c0_17 = arith.constant 0 : index
      %30 = vector.load %arg4[%c0_15, %c0_16, %c0_17] : memref<1x4x1xf32, #tpu.memory_space<vmem>>, vector<1x4x1xf32>
      %31 = vector.shape_cast %30 : vector<1x4x1xf32> to vector<4x1xf32>
      %32 = arith.addf %31, %10 : vector<4x1xf32>
      %33 = arith.mulf %22, %22 : vector<4x1xf32>
      %cst_18 = arith.constant 2.560000e+02 : f32
      %34 = arith.mulf %18, %cst_18 : f32
      %35 = arith.divf %34, %19 : f32
      %36 = vector.broadcast %35 : f32 to vector<4x1xf32>
      %37 = arith.mulf %33, %36 : vector<4x1xf32>
      %38 = arith.addf %32, %37 : vector<4x1xf32>
      %c0_19 = arith.constant 0 : index
      %c0_20 = arith.constant 0 : index
      %c0_21 = arith.constant 0 : index
      %39 = vector.load %arg4[%c0_19, %c0_20, %c0_21] : memref<1x4x1xf32, #tpu.memory_space<vmem>>, vector<1x4x1xf32>
      %40 = vector.shape_cast %39 : vector<1x4x1xf32> to vector<4x1xf32>
      %41 = vector.shape_cast %38 : vector<4x1xf32> to vector<1x4x1xf32>
      tpu.vector_store %arg4[%c0_19, %c0_20, %c0_21], %41 {strides = array<i32>} : memref<1x4x1xf32, #tpu.memory_space<vmem>>, vector<1x4x1xf32>,
    } else {
    }
    return
  }
  func.func @transform_0(%arg0: i32, %arg1: i32) -> (i32, i32, i32) {
    %c0_i32 = arith.constant 0 : i32
    %c0_i32_0 = arith.constant 0 : i32
    return %arg0, %c0_i32, %arg1 : i32, i32, i32
  }
  func.func @transform_1(%arg0: i32, %arg1: i32) -> (i32, i32, i32) {
    %c0_i32 = arith.constant 0 : i32
    %c0_i32_0 = arith.constant 0 : i32
    %c0_i32_1 = arith.constant 0 : i32
    return %arg0, %c0_i32, %c0_i32_0 : i32, i32, i32
  }
  func.func @transform_2(%arg0: i32, %arg1: i32) -> (i32, i32, i32) {
    %c0_i32 = arith.constant 0 : i32
    %c0_i32_0 = arith.constant 0 : i32
    %c0_i32_1 = arith.constant 0 : i32
    return %arg0, %c0_i32, %c0_i32_0 : i32, i32, i32
  }
}

</mosaic_0001>

<bundles_post_ra>
// kernel: tpu_custom_call.1
= control target key start
LH: loop header
LB: loop body
LE: loop exit
PB: predicated region body
PF: predicated region fallthrough
CT: control target
= control target key end

     0   :  { %8 = vsyncpa [#allocation3], 0  ;;  %s665_s0 = inlined_call_operand.hbm [shape: f32[2,4,256], index: 0, kind: input, shape index: {}]   ;;  %s666_s1 = inlined_call_operand.vmem [shape: f32[2,4,1], index: 1, kind: output, shape index: {0}]   ;;  %s667_s2 = inlined_call_operand.vmem [shape: f32[2,4,1], index: 2, kind: output, shape index: {1}]  }
   0x1   :  { %10 = vsyncpa [#allocation3 + $0x1], 0  ;;  %s533_s9 = smov 0   ;;  %s535_s10 = smov 0  }
   0x2   :  { %s537_s11 = smov 0   ;;  %s539_s12 = smov 0  }
   0x3   :  { %s541_s13 = smov 0   ;;  %s543_s14 = smov 0  }
   0x4 LB: > { %s363_s15 = sadd.s32 4294967295, %s514_s14   ;;  %s28_s16 = sadd.s32 1, %s510_s13  ;;  %s514_s14 = sphi %s543_s14, %s16_s14   ;;  %s510_s13 = sphi %s541_s13, %s677_s13   ;;  %s506_s12 = sphi %s539_s12, %s676_s12   ;;  %s502_s11 = sphi %s537_s11, %s675_s11   ;;  %s498_s10 = sphi %s535_s10, %s674_s10   ;;  %s494_s9 = sphi %s533_s9, %s673_s9  }
   0x5   : > { %p30_p0 = scmp.ge.s32.totalorder %s28_s16, 2  ;;  %s37_s17 = sadd.s32 1, %s502_s11 }
   0x6   : > { %p44_p1 = scmp.ne.s32.totalorder %s502_s11, %s498_s10  ;;  %p45_p2 = scmp.eq.s32.totalorder %s514_s14, 0 }
   0x7   : > { %s679_s16 = smov (%p30_p0, %s28_s16), 0  ;;  %p50_p4 = scmp.ne.s32.totalorder %s498_s10, %s494_s9 }
   0x8   : > { %p569_p3 = por %p45_p2, %p44_p1  ;;  %s32_s19 = ssub.s32 %s510_s13, %s679_s16 }
   0x9   : > { %p51_p5 = scmp.eq.s32.totalorder %s363_s15, 0  ;;  %p35_p6 = scmp.eq.s32.totalorder %s32_s19, 0 }
   0xa   : > { %p383_p8 = scmp.lt.s32.totalorder %s514_s14, 2  ;;  %s126_s22 = sand.u32 1, %s502_s11  }
   0xb   : > { %p576_p7 = por %p51_p5, %p50_p4  ;;  %s376_s23 = sshll.u32 %s510_s13, 7 }
   0xc   : > { %s582_s21 = scalar_select %p35_p6, %s502_s11, %s37_s17  }
   0xd   : > { %s367_s24 = sshll.u32 %s126_s22, 3  ;;  %s589_s27 = scalar_lea.hbm %s665_s0, %s376_s23 }
   0xe   : > { %s130_s28 = scalar_lea.vmem [#allocation2], %s367_s24  ;;  %p593_p9 = pnand %p383_p8, %p569_p3 }
   0xf   : > { %s140_s29 = sshll.u32 %s130_s28, 4  ;;  %s127_s3 = scalar_lea.sflag [#allocation3], %s126_s22  ;;  %s597_s29 = int_to_ptr.vmem [resolvable:$true] %s140_s29 }
  0x10   : > { %s434_s4 = scalar_lea.hbm %s589_s27, 128  ;;  %p436_p13 = pneg %p593_p9 }
  0x11   : > { %p435_p12 = scmp.ne.s32.totalorder %s589_s27, %s434_s4  ;;  %s439_s7 = scalar_lea.hbm %s665_s0, 256 }
  0x12   : > { %p440_p2 = scmp.lt.u32.totalorder %s589_s27, %s665_s0  ;;  %p441_p3 = scmp.lt.u32.totalorder %s439_s7, %s434_s4 }
  0x13   : > { %p437_p0 = pnand %p436_p13, %p435_p12  ;;  %p443_p5 = scmp.lt.u32.totalorder %s434_s4, %s589_s27 }
  0x14   : > { %p442_p4 = por %p441_p3, %p440_p2 }
  0x15   : > { %p438_p1 = pneg %p437_p0 }
  0x16   : > { %p444_p6 = por %p443_p5, %p442_p4 }
  0x18   : > { %p445_p8 = pnand %p444_p6, %p438_p1 }
  0x1a   : > { %448 = shalt.err (!%p445_p8)
}
  0x1b   : > { %s449_s15 = scalar_lea.vmem %s597_s29, 128  ;;  %s516_s17 = smov [#allocation2]  }
  0x1c   : > { %p450_p12 = scmp.ne.s32.totalorder %s597_s29, %s449_s15  ;;  %s454_s18 = sshll.u32 %s516_s17, 4  ;;  %s455_s18 = int_to_ptr.vmem [resolvable:$false] %s454_s18 }
  0x1d   : > { %s456_s19 = scalar_lea.vmem %s455_s18, 256  ;;  %p457_p11 = scmp.lt.s32.totalorder %s597_s29, %s455_s18 }
  0x1e   : > { %p452_p0 = pnand %p450_p12, %p436_p13  ;;  %p458_p2 = scmp.lt.s32.totalorder %s456_s19, %s449_s15 }
  0x20   : > { %p453_p10 = pneg %p452_p0  ;;  %p459_p3 = por %p458_p2, %p457_p11 }
  0x22   : > { %p460_p4 = pnand %p459_p3, %p453_p10 }
  0x24   : > { %463 = shalt.err (!%p460_p4)
}
  0x25   : > { %382 = dma.hbm_to_vmem [thread:$0]  (!%p593_p9), %s589_s27, 128, %s597_s29, %s127_s3  }
  0x26   : > { %p671_p1 = scmp.lt.s32.totalorder %s514_s14, 3  ;;  %p672_p5 = scmp.ge.s32.totalorder %s514_s14, 1 }
  0x28   : > { %p146_p13 = pnand %p672_p5, %p671_p1 }
  0x29   : > { %s151_s22 = sand.u32 (!%p146_p13), 1, %s498_s10  }
  0x2a   : > { %149 = sbr.rel (%p146_p13) target bundleno = 354 (0x162), region = 24  ;;  %s371_s23 = sshll.u32 (!%p146_p13), %s151_s22, 3 }
  0x2b   : > { %s152_s24 = scalar_lea.sflag (!%p146_p13), [#allocation3], %s151_s22  ;;  %s155_s25 = scalar_lea.vmem (!%p146_p13), [#allocation2], %s371_s23 }
  0x31   : > { %489 = dma.done.wait (%p576_p7), %s152_s24, 128  }
  0x32   : > { %491 = vsyncadd (%p576_p7), %s152_s24, 4294967168  ;;  %vm192_vm0 = vcmask 1043456   ;;  %v188_v0 = vld [vmem:[%s155_s25] sm:$0xff]  ;;  %p180_p9 = scmp.lt.s32.totalorder %s506_s12, 1  ;;  %v517_v5 = vmov 839922192   ;;  %v204_v7 = vlaneseq }
  0x33   : > { %v190_v1 = vcombine.high %v188_v0, %v188_v0  ;;  %v193_v2 = vsel %vm192_vm0, %v188_v0, 0.0  ;;  %v202_v6 = vunpack.c.l.s4 %v517_v5  ;;  %vm223_vm1 = vcmask 3072  }
  0x34   : > { %s681_s12 = smov (!%p180_p9, %s506_s12), 1  ;;  %v205_v9 = vshrl.u32 %v204_v7, 7 }
  0x35   : > { %v194_v3 = vsel %vm192_vm0, %v190_v1, 0.0  ;;  %v203_v8 = vunpack.c.0.s8 %v202_v6  ;;  %s372_s20 = sshll.u32 %s681_s12, 2 }
  0x36   : > { %v195_v4 = vadd.f32 %v194_v3, %v193_v2  ;;  %s183_s28 = scalar_lea.vmem %s666_s1, %s372_s20  ;;  %s187_s30 = scalar_lea.vmem %s667_s2, %s372_s20 }
  0x37   : > { %v206_v10 = vsub.s32 %v203_v8, %v205_v9 }
  0x38   : > { %196 = vadd.xlane.f32.xlu0 %v195_v4 }
  0xc5   : > { %v197_v11 = vpop.xlane.xlu0 %196 }
  0xc6   : > { %v199_v12 = vmul.f32 0.00390625, %v197_v11 }
  0xc8   : > { %v207_v13 = vrot.slane %v199_v12, %v206_v10  ;;  %224 = vst.msk [vmem:[%s183_s28] sm:$0xf] %vm223_vm1, %v199_v12 }
  0xca   : > { %v209_v14 = vsub.f32 %v188_v0, %v207_v13 }
  0xcc   : > { %v210_v15 = vmul.f32 %v209_v14, %v209_v14 }
  0xce   : > { %v212_v16 = vcombine.high %v210_v15, %v210_v15  ;;  %v214_v17 = vsel %vm192_vm0, %v210_v15, 0.0 }
  0xd0   : > { %v215_v18 = vsel %vm192_vm0, %v212_v16, 0.0 }
  0xd1   : > { %v216_v19 = vadd.f32 %v215_v18, %v214_v17 }
  0xd3   : > { %217 = vadd.xlane.f32.xlu0 %v216_v19 }
 0x160   : > { %v218_v20 = vpop.xlane.xlu0 %217 }
 0x161   : > { %225 = vst.msk [vmem:[%s187_s30] sm:$0xf] %vm223_vm1, %v218_v20 }
 0x162 PF: > { %s16_s14 = sadd.s32 1, %s514_s14   ;;  %s673_s9 = smov %s498_s10 }
 0x163   : > { %p13_p7 = scmp.ge.s32.totalorder %s16_s14, 4   ;;  %s674_s10 = smov %s502_s11 }
 0x164   : > { %s675_s11 = smov %s582_s21  ;;  %s676_s12 = smov %s510_s13 }
 0x165   : > { %s677_s13 = smov %s679_s16  ;;  %15 = sbr.rel (!%p13_p7) target bundleno = 4 (0x4), region = 84 }
 0x16c   :  { %289 = vsyncpa [#allocation3], 1 }
 0x16d   :  { %291 = vsyncpa [#allocation3 + $0x1], 1 }

</bundles_post_ra>
